<compile_context>
chip_gen: v6e
topology: v6e:2x2x1
jax: 0.10.0
libtpu: 0.0.40
codegen_flags: <defaults>
</compile_context>

<pallas_src>
import jax
import jax.numpy as jnp
from jax.experimental import pallas as pl
from jax.experimental.pallas import tpu as pltpu


def _normalization_kernel(x_ref, scale_ref, bias_ref, o_ref):
    # x_ref:     (TR, THW) tile of the flattened (N*C, H*W) image
    # scale_ref: (TR, 1)   per-row scale = 1 / (255 * std[channel(row)])
    # bias_ref:  (TR, 1)   per-row bias  = mean[channel(row)] / std[channel(row)]
    # Pure fused multiply-subtract on the VPU; no divides in the kernel.
    o_ref[...] = x_ref[...] * scale_ref[...] - bias_ref[...]


def _pick_tile(total, target, align):
    """Largest multiple of `align` <= target that divides `total`; else full extent."""
    if total % align != 0 or total <= align:
        # Non-aligned extent: use the full dimension as the block (still correct,
        # just masked stores if the lane dim is not a multiple of 128).
        return total
    t = min(target, total)
    t -= t % align
    while t > align and total % t != 0:
        t -= align
    if t <= 0 or total % t != 0:
        return total
    return t


def normalization_forward(img, mean, std, *, row_tile_target=256, hw_tile_target=2048):
    """img: (N, C, H, W) float; mean/std: (C,) float -> (N, C, H, W) normalized."""
    n, c, h, w = img.shape
    hw = h * w
    rows = n * c
    dtype = img.dtype

    # Fold both divides into per-channel constants (tiny C-element host-side ops).
    scale_c = (1.0 / (255.0 * std)).astype(dtype)   # (C,)
    bias_c = (mean / std).astype(dtype)             # (C,)
    # Per-row constants aligned with the flattened (N*C, H*W) layout.
    scale_rows = jnp.tile(scale_c, n).reshape(rows, 1)
    bias_rows = jnp.tile(bias_c, n).reshape(rows, 1)

    x = img.reshape(rows, hw)

    tr = _pick_tile(rows, row_tile_target, 8)      # sublane-dense row tile
    thw = _pick_tile(hw, hw_tile_target, 128)      # lane-dense spatial tile
    grid = (rows // tr, hw // thw)

    # TODO(synk): if the raw image is really uint8, accept uint8 here and cast
    # inside the kernel to cut HBM read traffic 4x; kept f32 to match the module.
    out = pl.pallas_call(
        _normalization_kernel,
        out_shape=jax.ShapeDtypeStruct((rows, hw), dtype),
        grid_spec=pltpu.PrefetchScalarGridSpec(
            num_scalar_prefetch=0,
            grid=grid,
            in_specs=[
                pl.BlockSpec((tr, thw), lambda r, s: (r, s)),
                pl.BlockSpec((tr, 1), lambda r, s: (r, 0)),
                pl.BlockSpec((tr, 1), lambda r, s: (r, 0)),
            ],
            out_specs=pl.BlockSpec((tr, thw), lambda r, s: (r, s)),
        ),
        compiler_params=pltpu.CompilerParams(
            dimension_semantics=("parallel", "parallel"),
            vmem_limit_bytes=32 * 1024 * 1024,
        ),
    )(x, scale_rows, bias_rows)

    return out.reshape(n, c, h, w)


if __name__ == "__main__":
    key = jax.random.PRNGKey(0)
    N, C, H, W = 2, 3, 16, 16

    # Standard ImageNet / VGG normalization constants (match shapes implied by
    # Normalization.__init__: mean/std viewed as (C, 1, 1)).
    mean = jnp.array([0.485, 0.456, 0.406], dtype=jnp.float32)
    std = jnp.array([0.229, 0.224, 0.225], dtype=jnp.float32)

    # Deterministic input in [0, 255) like a raw image cast to float.
    img = jax.random.uniform(key, (N, C, H, W), dtype=jnp.float32) * 255.0

    out = normalization_forward(img, mean, std)
    out = jax.block_until_ready(out)

    # Reference in plain JAX (same math as the PyTorch forward).
    ref = (img / 255.0 - mean.reshape(1, C, 1, 1)) / std.reshape(1, C, 1, 1)
    assert jnp.allclose(out, ref, atol=1e-5, rtol=1e-5), float(
        jnp.max(jnp.abs(out - ref))
    )

    print("KERNEL_OK")
</pallas_src>

<mosaic_0001>
module attributes {stable_mosaic.version = 11 : i64} {
  func.func @_normalization_kernel(%arg0: i32, %arg1: i32, %arg2: memref<6x256xf32, #tpu.memory_space<vmem>>, %arg3: memref<6x1xf32, #tpu.memory_space<vmem>>, %arg4: memref<6x1xf32, #tpu.memory_space<vmem>>, %arg5: memref<6x256xf32, #tpu.memory_space<vmem>>) attributes {dimension_semantics = [#tpu.dimension_semantics<parallel>, #tpu.dimension_semantics<parallel>], iteration_bounds = array<i64: 1, 1>, scalar_prefetch = 0 : i64, scratch_operands = 0 : i64, tpu.core_type = #tpu.core_type<tc>, window_params = [{transform_indices = @transform_0, window_bounds = array<i64: 6, 256>}, {transform_indices = @transform_1, window_bounds = array<i64: 6, 1>}, {transform_indices = @transform_2, window_bounds = array<i64: 6, 1>}, {transform_indices = @transform_3, window_bounds = array<i64: 6, 256>}]} {
    %c0 = arith.constant 0 : index
    %c0_0 = arith.constant 0 : index
    %0 = vector.load %arg2[%c0, %c0_0] : memref<6x256xf32, #tpu.memory_space<vmem>>, vector<6x256xf32>
    %c0_1 = arith.constant 0 : index
    %c0_2 = arith.constant 0 : index
    %1 = vector.load %arg3[%c0_1, %c0_2] : memref<6x1xf32, #tpu.memory_space<vmem>>, vector<6x1xf32>
    %2 = vector.broadcast %1 : vector<6x1xf32> to vector<6x256xf32>
    %3 = arith.mulf %0, %2 : vector<6x256xf32>
    %c0_3 = arith.constant 0 : index
    %c0_4 = arith.constant 0 : index
    %4 = vector.load %arg4[%c0_3, %c0_4] : memref<6x1xf32, #tpu.memory_space<vmem>>, vector<6x1xf32>
    %5 = vector.broadcast %4 : vector<6x1xf32> to vector<6x256xf32>
    %6 = arith.subf %3, %5 : vector<6x256xf32>
    %c0_5 = arith.constant 0 : index
    %c0_6 = arith.constant 0 : index
    %7 = vector.load %arg5[%c0_5, %c0_6] : memref<6x256xf32, #tpu.memory_space<vmem>>, vector<6x256xf32>
    tpu.vector_store %arg5[%c0_5, %c0_6], %6 {strides = array<i32>} : memref<6x256xf32, #tpu.memory_space<vmem>>, vector<6x256xf32>,
    return
  }
  func.func @transform_0(%arg0: i32, %arg1: i32) -> (i32, i32) {
    %c0_i32 = arith.constant 0 : i32
    return %arg0, %arg1 : i32, i32
  }
  func.func @transform_1(%arg0: i32, %arg1: i32) -> (i32, i32) {
    %c0_i32 = arith.constant 0 : i32
    %c0_i32_0 = arith.constant 0 : i32
    return %arg0, %c0_i32 : i32, i32
  }
  func.func @transform_2(%arg0: i32, %arg1: i32) -> (i32, i32) {
    %c0_i32 = arith.constant 0 : i32
    %c0_i32_0 = arith.constant 0 : i32
    return %arg0, %c0_i32 : i32, i32
  }
  func.func @transform_3(%arg0: i32, %arg1: i32) -> (i32, i32) {
    %c0_i32 = arith.constant 0 : i32
    return %arg0, %arg1 : i32, i32
  }
}

</mosaic_0001>

<bundles_post_ra>
// kernel: tpu_custom_call.1
= control target key start
LH: loop header
LB: loop body
LE: loop exit
PB: predicated region body
PF: predicated region fallthrough
CT: control target
= control target key end

     0   :  { %v74_v1 = vmov 0   ;;  %s111_s0 = inlined_call_operand.vmem [shape: f32[6,256], index: 0, kind: input, shape index: {}]   ;;  %s112_s1 = inlined_call_operand.vmem [shape: f32[6,1], index: 1, kind: input, shape index: {}]   ;;  %s113_s2 = inlined_call_operand.vmem [shape: f32[6,1], index: 2, kind: input, shape index: {}]   ;;  %s114_s3 = inlined_call_operand.hbm [shape: f32[6,256], index: 3, kind: output, shape index: {}]  }
   0x1   :  { %v17_v0 = vld [vmem:[%s112_s1] sm:$0x3f]  ;;  %51 = vset.pattern.permute.xlu0 %v74_v1 }
   0x2   :  { %8 = vsyncpa [#allocation3], 0  ;;  %20 = vperm.xlu0 %51, %v17_v0   ;;  %v25_v2 = vld [vmem:[%s113_s2] sm:$0x3f]  ;;  %v16_v5 = vld [vmem:[%s111_s0 + $0x8] sm:$0x3f] }
   0x3   :  { %v15_v4 = vld [vmem:[%s111_s0] sm:$0x3f]  ;;  %s75_s20 = smov [#allocation2]  }
   0x4   :  { %s41_s1 = sshll.u32 %s75_s20, 4  ;;  %s42_s1 = int_to_ptr.vmem [resolvable:$true] %s41_s1 }
   0x5   :  { %s52_s2 = scalar_lea.vmem %s42_s1, 256  ;;  %p57_p1 = scmp.lt.s32.totalorder %s42_s1, %s42_s1 }
   0x6   :  { %28 = vperm.xlu0 %51, %v25_v2   ;;  %p53_p0 = scmp.ne.s32.totalorder %s42_s1, %s52_s2  ;;  %p58_p2 = scmp.lt.s32.totalorder %s52_s2, %s52_s2 }
   0x8   :  { %p59_p3 = por %p58_p2, %p57_p1 }
   0xa   :  { %p60_p4 = pnand %p59_p3, %p53_p0 }
  0x7d   :  { %v21_v3 = vpop.permute.xlu0 %20 }
  0x7e   :  { %v23_v6 = vmul.f32 %v21_v3, %v15_v4  ;;  %v24_v7 = vmul.f32 %v21_v3, %v16_v5 }
  0x81   :  { %v29_v8 = vpop.permute.xlu0 %28 }
  0x82   :  { %v31_v9 = vsub.f32 %v23_v6, %v29_v8  ;;  %v32_v10 = vsub.f32 %v24_v7, %v29_v8 }
  0x84   :  { %33 = vst [vmem:[#allocation2] sm:$0x3f] %v31_v9  ;;  %34 = vst [vmem:[#allocation2 + $0x8] sm:$0x3f] %v32_v10 }
  0x85   :  { %63 = shalt.err (!%p60_p4)
}
  0x86   :  { %44 = dma.vmem_to_hbm [thread:$0]  %s42_s1, 256, %s114_s3, [#allocation3]  }
  0x87   :  { %72 = dma.done.wait [#allocation3], 256  }
  0x88   :  { %73 = vsyncadd [#allocation3], 4294967040 }
  0x89   :  { %48 = vsyncpa [#allocation3], 1 }

</bundles_post_ra>
